<compile_context>
chip_gen: v7x
topology: tpu7x:2x2x1
jax: 0.10.0
libtpu: 0.0.40
codegen_flags: <defaults>
</compile_context>

<pallas_src>
import numpy as np
import jax
import jax.numpy as jnp
from jax import lax
from jax.experimental import pallas as pl
from jax.experimental.pallas import tpu as pltpu

EPS = 1e-5


# ----------------------------------------------------------------------------------
# Tiling / budget helpers
# ----------------------------------------------------------------------------------
def _vmem_limit_bytes():
    """Generation-aware scoped-VMEM budget: ~3/4 of physical, capped at 100 MiB."""
    cap = 64 * 1024 * 1024
    try:
        cap = int(pltpu.get_tpu_info().vmem_capacity_bytes)
    except Exception:
        pass
    return int(min(100 * 1024 * 1024, (cap * 3) // 4))


def _pick_m_tiling(n, dhw, target=8192):
    """Choose the M tile so the BN-apply kernel writes the final (N, Cout, D*H*W)
    layout directly.  Returns (TM, q, S) with TM = q * S:
      Case A: S = D*H*W and q | N    (whole spatial volumes per tile)
      Case B: q = 1 and S = TM | D*H*W (tile inside one volume)
    """
    best = None
    for q in range(1, n + 1):
        if n % q:
            continue
        tm = q * dhw
        if tm % 128 == 0 and tm <= target:
            best = (tm, q, dhw)
    if best is not None:
        return best
    for tm in (8192, 4096, 2048, 1024, 512, 256, 128):
        if tm <= dhw and dhw % tm == 0:
            return (tm, 1, tm)
    # Fallback: one whole-array block (always layout-legal; may be large).
    return (n * dhw, n, dhw)


def _pick_tk(kp, tm, vmem_budget):
    """Largest multiple-of-128 divisor of Kp whose double-buffered bf16 im2col block
    (2 * tk * TM * 2 bytes) fits in about a third of the VMEM budget."""
    nch = kp // 128
    for d in range(nch, 0, -1):
        if nch % d:
            continue
        tk = d * 128
        if 2 * tk * tm * 2 <= vmem_budget // 3:
            return tk
    return 128


# ----------------------------------------------------------------------------------
# Kernel 1: conv matmul (optionally K-tiled) + per-channel sum / sum-of-squares
# ----------------------------------------------------------------------------------
def _conv_stats_kernel(w_ref, p_ref, y_ref, stats_ref, acc_ref):
    i = pl.program_id(0)          # M tile ("arbitrary": stats accumulate across it)
    k = pl.program_id(1)          # K tile ("arbitrary": matmul accumulation)
    nk = pl.num_programs(1)

    @pl.when(jnp.logical_and(i == 0, k == 0))
    def _init_stats():
        stats_ref[...] = jnp.zeros_like(stats_ref)

    @pl.when(k == 0)
    def _init_acc():
        acc_ref[...] = jnp.zeros_like(acc_ref)

    # MXU: (Cout, tk) bf16 @ (tk, TM) bf16 -> f32 accumulate; M on the lane axis.
    acc_ref[...] += jnp.dot(w_ref[...], p_ref[...],
                            preferred_element_type=jnp.float32)

    @pl.when(k == nk - 1)
    def _finalize():
        y = acc_ref[...]
        y_ref[...] = y.astype(y_ref.dtype)        # bf16 intermediate, lane-dense store
        # Per-channel running sum / sum-of-squares from the f32 accumulator.
        stats_ref[:, 0:1] += jnp.sum(y, axis=1, keepdims=True)
        stats_ref[:, 1:2] += jnp.sum(y * y, axis=1, keepdims=True)


# ----------------------------------------------------------------------------------
# Kernel 2: folded BatchNorm FMA, writing the (N, Cout, D*H*W) layout directly
# ----------------------------------------------------------------------------------
def _bn_apply_kernel(y_ref, bn_ref, o_ref):
    # bn lanes: [0] = scale (gamma * inv_std), [1] = shift (beta - mean * scale)
    scale = bn_ref[:, 0:1]
    shift = bn_ref[:, 1:2]
    # Upcast bf16 -> f32 before the FMA (v5e has no bf16 VPU; stats are f32 anyway).
    z = y_ref[...].astype(jnp.float32) * scale + shift        # (Cout, q*S)
    q = o_ref.shape[0]
    s = o_ref.shape[2]
    for ni in range(q):                                       # static, small
        o_ref[ni, :, :] = z[:, ni * s:(ni + 1) * s]           # lane-aligned slices


# ----------------------------------------------------------------------------------
# Wrapper
# ----------------------------------------------------------------------------------
def deconv_resnet_forward(x_ncdhw, wt, gamma, beta, *, tm_target=8192):
    """x_ncdhw: (N, Cin, D, H, W); wt: ConvTranspose3d weight (Cin, Cout, 3, 3, 3)."""
    N, Cin, D, H, W = x_ncdhw.shape
    Cout, ksz = wt.shape[1], wt.shape[2]
    assert ksz == 3 and wt.shape == (Cin, Cout, ksz, ksz, ksz)

    DHW = D * H * W
    M = N * DHW
    K = ksz * ksz * ksz * Cin
    Kp = ((K + 127) // 128) * 128                 # pad contraction dim to 128-multiple

    vmem_budget = _vmem_limit_bytes()
    TM, q, S = _pick_m_tiling(N, DHW, tm_target)
    n_tiles = M // TM
    bpn = DHW // S
    tk = _pick_tk(Kp, TM, vmem_budget)
    n_k = Kp // tk

    # ConvTranspose3d(stride=1, padding=1, kernel=3) == Conv3d(padding=1) with the
    # spatially flipped, channel-transposed kernel.  Weight as (Cout, Kp) bf16.
    w_conv = jnp.transpose(jnp.flip(wt, axis=(2, 3, 4)), (2, 3, 4, 0, 1))  # (kd,kh,kw,Cin,Cout)
    w_mat = jnp.transpose(w_conv.reshape(K, Cout), (1, 0))                 # (Cout, K)
    w_mat = jnp.pad(w_mat, ((0, 0), (0, Kp - K))).astype(jnp.bfloat16)     # (Cout, Kp)

    # im2col directly in transposed (Kp, M) layout, bf16 (M = lane axis).
    # TODO(synk): build these 27 taps inside the kernel (halo DMA / shifted slices over
    # the padded input) instead of a 27x HBM materialization.
    x = jnp.transpose(x_ncdhw, (0, 2, 3, 4, 1)).astype(jnp.bfloat16)       # (N,D,H,W,Cin)
    xp = jnp.pad(x, ((0, 0), (1, 1), (1, 1), (1, 1), (0, 0)))
    taps = [xp[:, kd:kd + D, kh:kh + H, kw:kw + W, :]
            for kd in range(ksz) for kh in range(ksz) for kw in range(ksz)]
    pT = jnp.stack(taps, axis=0)                                           # (27,N,D,H,W,Cin)
    pT = jnp.transpose(pT, (0, 5, 1, 2, 3, 4)).reshape(K, M)               # (K, M)
    pT = jnp.pad(pT, ((0, Kp - K), (0, 0)))                                # (Kp, M) bf16

    cparams1 = pltpu.CompilerParams(
        dimension_semantics=("arbitrary", "arbitrary"),   # stats + matmul accumulation
        vmem_limit_bytes=vmem_budget)
    cparams2 = pltpu.CompilerParams(
        dimension_semantics=("parallel",),
        vmem_limit_bytes=vmem_budget)

    # ---- pass 1: conv matmul (+ optional K tiling) + BN statistics -------------------
    y_flat, stats = pl.pallas_call(
        _conv_stats_kernel,
        grid=(n_tiles, n_k),
        in_specs=[
            pl.BlockSpec((Cout, tk), lambda i, k: (0, k)),    # weights (VMEM-resident)
            pl.BlockSpec((tk, TM), lambda i, k: (k, i)),      # pipelined im2col tiles
        ],
        out_specs=(
            pl.BlockSpec((Cout, TM), lambda i, k: (0, i)),    # conv output, lane-dense
            pl.BlockSpec((Cout, 128), lambda i, k: (0, 0)),   # resident stats accumulator
        ),
        out_shape=(
            jax.ShapeDtypeStruct((Cout, M), jnp.bfloat16),
            jax.ShapeDtypeStruct((Cout, 128), jnp.float32),
        ),
        scratch_shapes=[pltpu.VMEM((Cout, TM), jnp.float32)],
        compiler_params=cparams1,
        cost_estimate=pl.CostEstimate(
            flops=2 * M * Kp * Cout,
            transcendentals=0,
            bytes_accessed=pT.size * 2 + w_mat.size * 2 + Cout * M * 2 + Cout * 128 * 4,
        ),
    )(w_mat, pT)

    # O(Cout) glue: fold mean/var/gamma/beta into per-channel scale & shift.
    inv_m = 1.0 / float(M)
    mean = stats[:, 0] * inv_m
    var = jnp.maximum(stats[:, 1] * inv_m - mean * mean, 0.0)   # biased var (PyTorch BN)
    scale = gamma.astype(jnp.float32) * lax.rsqrt(var + EPS)
    shift = beta.astype(jnp.float32) - mean * scale
    bn = jnp.zeros((Cout, 128), jnp.float32)
    bn = bn.at[:, 0].set(scale).at[:, 1].set(shift)

    # ---- pass 2: folded BN FMA writing the (N, Cout, D*H*W) layout directly ----------
    out3 = pl.pallas_call(
        _bn_apply_kernel,
        grid=(n_tiles,),
        in_specs=[
            pl.BlockSpec((Cout, TM), lambda i: (0, i)),
            pl.BlockSpec((Cout, 128), lambda i: (0, 0)),
        ],
        out_specs=pl.BlockSpec((q, Cout, S), lambda i: (i // bpn, 0, i % bpn)),
        out_shape=jax.ShapeDtypeStruct((N, Cout, DHW), jnp.float32),
        compiler_params=cparams2,
        cost_estimate=pl.CostEstimate(
            flops=2 * Cout * M,
            transcendentals=0,
            bytes_accessed=Cout * M * 2 + Cout * 128 * 4 + Cout * M * 4,
        ),
    )(y_flat, bn)

    return out3.reshape(N, Cout, D, H, W)                       # free reshape -> NCDHW


# ----------------------------------------------------------------------------------
# Plain-JAX reference (mirrors the kernel's bf16-rounded inputs, f32 accumulation)
# ----------------------------------------------------------------------------------
def reference_forward(x_ncdhw, wt, gamma, beta):
    xb = x_ncdhw.astype(jnp.bfloat16).astype(jnp.float32)
    wb = wt.astype(jnp.bfloat16).astype(jnp.float32)
    w_oi = jnp.transpose(jnp.flip(wb, axis=(2, 3, 4)), (1, 0, 2, 3, 4))  # (Cout, Cin, 3,3,3)
    y = lax.conv_general_dilated(
        xb, w_oi, window_strides=(1, 1, 1), padding=[(1, 1)] * 3,
        dimension_numbers=("NCDHW", "OIDHW", "NCDHW"),
        precision=lax.Precision.HIGHEST)
    mean = jnp.mean(y, axis=(0, 2, 3, 4), keepdims=True)
    var = jnp.mean((y - mean) ** 2, axis=(0, 2, 3, 4), keepdims=True)
    g = gamma.reshape(1, -1, 1, 1, 1)
    b = beta.reshape(1, -1, 1, 1, 1)
    return (y - mean) * lax.rsqrt(var + EPS) * g + b


if __name__ == "__main__":
    # Small shapes consistent with the module: N=2, Cin=4, Cout=8, D=H=W=8.
    N, Cin, Cout, D, H, W = 2, 4, 8, 8, 8, 8
    ksz = 3

    key = jax.random.PRNGKey(0)
    kx, kw = jax.random.split(key)

    x = jax.random.normal(kx, (N, Cin, D, H, W), dtype=jnp.float32)

    # Deterministic xavier_uniform_ for ConvTranspose3d weight (Cin, Cout, 3, 3, 3):
    # PyTorch fans for this layout: fan_in = Cout*27, fan_out = Cin*27.
    fan_in = Cout * ksz ** 3
    fan_out = Cin * ksz ** 3
    bound = float(np.sqrt(6.0 / (fan_in + fan_out)))
    wt = jax.random.uniform(kw, (Cin, Cout, ksz, ksz, ksz),
                            minval=-bound, maxval=bound, dtype=jnp.float32)

    # BatchNorm3d default init: gamma=1, beta=0 (running stats unused in train-mode fwd).
    gamma = jnp.ones((Cout,), dtype=jnp.float32)
    beta = jnp.zeros((Cout,), dtype=jnp.float32)

    out = jax.block_until_ready(deconv_resnet_forward(x, wt, gamma, beta))
    ref = jax.block_until_ready(reference_forward(x, wt, gamma, beta))

    # The bf16 conv->BN intermediate adds <= 2^-8 relative error on top of the shared
    # bf16-input rounding (BN stats themselves stay f32), hence rtol=5e-3.
    np.testing.assert_allclose(np.asarray(out), np.asarray(ref), rtol=5e-3, atol=1e-3)
    assert out.shape == (N, Cout, D, H, W)

    print("KERNEL_OK")
</pallas_src>

<mosaic_0001>
module attributes {stable_mosaic.version = 11 : i64} {
  func.func @_conv_stats_kernel(%arg0: i32, %arg1: i32, %arg2: memref<8x128xbf16, #tpu.memory_space<vmem>>, %arg3: memref<128x1024xbf16, #tpu.memory_space<vmem>>, %arg4: memref<8x1024xbf16, #tpu.memory_space<vmem>>, %arg5: memref<8x128xf32, #tpu.memory_space<vmem>>, %arg6: memref<8x1024xf32, #tpu.memory_space<vmem>>) attributes {dimension_semantics = [#tpu.dimension_semantics<arbitrary>, #tpu.dimension_semantics<arbitrary>], iteration_bounds = array<i64: 1, 1>, scalar_prefetch = 0 : i64, scratch_operands = 1 : i64, tpu.core_type = #tpu.core_type<tc>, window_params = [{transform_indices = @transform_0, window_bounds = array<i64: 8, 128>}, {transform_indices = @transform_1, window_bounds = array<i64: 128, 1024>}, {transform_indices = @transform_2, window_bounds = array<i64: 8, 1024>}, {pipeline_mode = #tpu.pipeline_mode<synchronous>, transform_indices = @transform_3, window_bounds = array<i64: 8, 128>}]} {
    %c0_i32 = arith.constant 0 : i32
    %0 = arith.cmpi eq, %arg0, %c0_i32 : i32
    %c0_i32_0 = arith.constant 0 : i32
    %1 = arith.cmpi eq, %arg1, %c0_i32_0 : i32
    %2 = arith.andi %0, %1 : i1
    %3 = arith.extui %2 : i1 to i32
    %c0_i32_1 = arith.constant 0 : i32
    %4 = arith.cmpi ne, %3, %c0_i32_1 : i32
    scf.if %4 {
      %cst_13 = arith.constant 0.000000e+00 : f32
      %17 = vector.broadcast %cst_13 : f32 to vector<8x128xf32>
      %c0_14 = arith.constant 0 : index
      %c0_15 = arith.constant 0 : index
      %18 = vector.load %arg5[%c0_14, %c0_15] : memref<8x128xf32, #tpu.memory_space<vmem>>, vector<8x128xf32>
      tpu.vector_store %arg5[%c0_14, %c0_15], %17 {strides = array<i32>} : memref<8x128xf32, #tpu.memory_space<vmem>>, vector<8x128xf32>,
    } else {
    }
    %c0_i32_2 = arith.constant 0 : i32
    %5 = arith.cmpi eq, %arg1, %c0_i32_2 : i32
    %6 = arith.extui %5 : i1 to i32
    %c0_i32_3 = arith.constant 0 : i32
    %7 = arith.cmpi ne, %6, %c0_i32_3 : i32
    scf.if %7 {
      %cst_13 = arith.constant 0.000000e+00 : f32
      %17 = vector.broadcast %cst_13 : f32 to vector<8x1024xf32>
      %c0_14 = arith.constant 0 : index
      %c0_15 = arith.constant 0 : index
      %18 = vector.load %arg6[%c0_14, %c0_15] : memref<8x1024xf32, #tpu.memory_space<vmem>>, vector<8x1024xf32>
      tpu.vector_store %arg6[%c0_14, %c0_15], %17 {strides = array<i32>} : memref<8x1024xf32, #tpu.memory_space<vmem>>, vector<8x1024xf32>,
    } else {
    }
    %c0 = arith.constant 0 : index
    %c0_4 = arith.constant 0 : index
    %8 = vector.load %arg6[%c0, %c0_4] : memref<8x1024xf32, #tpu.memory_space<vmem>>, vector<8x1024xf32>
    %c0_5 = arith.constant 0 : index
    %c0_6 = arith.constant 0 : index
    %9 = vector.load %arg2[%c0_5, %c0_6] : memref<8x128xbf16, #tpu.memory_space<vmem>>, vector<8x128xbf16>
    %c0_7 = arith.constant 0 : index
    %c0_8 = arith.constant 0 : index
    %10 = vector.load %arg3[%c0_7, %c0_8] : memref<128x1024xbf16, #tpu.memory_space<vmem>>, vector<128x1024xbf16>
    %cst = arith.constant dense<0.000000e+00> : vector<8x1024xf32>
    %11 = tpu.matmul %9, %10, %cst {dimension_numbers = #tpu.dot_dimension_numbers<[1], [0], [0], [1], [0, 0, 1, 1], [], []>} : vector<8x128xbf16>, vector<128x1024xbf16>, vector<8x1024xf32> -> vector<8x1024xf32>
    %12 = arith.addf %8, %11 : vector<8x1024xf32>
    %c0_9 = arith.constant 0 : index
    %c0_10 = arith.constant 0 : index
    %13 = vector.load %arg6[%c0_9, %c0_10] : memref<8x1024xf32, #tpu.memory_space<vmem>>, vector<8x1024xf32>
    tpu.vector_store %arg6[%c0_9, %c0_10], %12 {strides = array<i32>} : memref<8x1024xf32, #tpu.memory_space<vmem>>, vector<8x1024xf32>,
    %c0_i32_11 = arith.constant 0 : i32
    %14 = arith.cmpi eq, %arg1, %c0_i32_11 : i32
    %15 = arith.extui %14 : i1 to i32
    %c0_i32_12 = arith.constant 0 : i32
    %16 = arith.cmpi ne, %15, %c0_i32_12 : i32
    scf.if %16 {
      %c0_13 = arith.constant 0 : index
      %c0_14 = arith.constant 0 : index
      %17 = vector.load %arg6[%c0_13, %c0_14] : memref<8x1024xf32, #tpu.memory_space<vmem>>, vector<8x1024xf32>
      %18 = arith.truncf %17 : vector<8x1024xf32> to vector<8x1024xbf16>
      %c0_15 = arith.constant 0 : index
      %c0_16 = arith.constant 0 : index
      %19 = vector.load %arg4[%c0_15, %c0_16] : memref<8x1024xbf16, #tpu.memory_space<vmem>>, vector<8x1024xbf16>
      tpu.vector_store %arg4[%c0_15, %c0_16], %18 {strides = array<i32>} : memref<8x1024xbf16, #tpu.memory_space<vmem>>, vector<8x1024xbf16>,
      %c0_17 = arith.constant 0 : index
      %c0_18 = arith.constant 0 : index
      %20 = vector.load %arg5[%c0_17, %c0_18] : memref<8x128xf32, #tpu.memory_space<vmem>>, vector<8x1xf32>
      %cst_19 = arith.constant dense<0.000000e+00> : vector<8xf32>
      %21 = vector.multi_reduction <add>, %17, %cst_19 [1] : vector<8x1024xf32> to vector<8xf32>
      %22 = vector.shape_cast %21 : vector<8xf32> to vector<8x1xf32>
      %23 = arith.addf %20, %22 : vector<8x1xf32>
      %c0_20 = arith.constant 0 : index
      %c0_21 = arith.constant 0 : index
      %24 = vector.load %arg5[%c0_20, %c0_21] : memref<8x128xf32, #tpu.memory_space<vmem>>, vector<8x1xf32>
      tpu.vector_store %arg5[%c0_20, %c0_21], %23 {strides = array<i32>} : memref<8x128xf32, #tpu.memory_space<vmem>>, vector<8x1xf32>,
      %c0_22 = arith.constant 0 : index
      %c1 = arith.constant 1 : index
      %25 = vector.load %arg5[%c0_22, %c1] : memref<8x128xf32, #tpu.memory_space<vmem>>, vector<8x1xf32>
      %26 = arith.mulf %17, %17 : vector<8x1024xf32>
      %cst_23 = arith.constant dense<0.000000e+00> : vector<8xf32>
      %27 = vector.multi_reduction <add>, %26, %cst_23 [1] : vector<8x1024xf32> to vector<8xf32>
      %28 = vector.shape_cast %27 : vector<8xf32> to vector<8x1xf32>
      %29 = arith.addf %25, %28 : vector<8x1xf32>
      %c0_24 = arith.constant 0 : index
      %c1_25 = arith.constant 1 : index
      %30 = vector.load %arg5[%c0_24, %c1_25] : memref<8x128xf32, #tpu.memory_space<vmem>>, vector<8x1xf32>
      tpu.vector_store %arg5[%c0_24, %c1_25], %29 {strides = array<i32>} : memref<8x128xf32, #tpu.memory_space<vmem>>, vector<8x1xf32>,
    } else {
    }
    return
  }
  func.func @transform_0(%arg0: i32, %arg1: i32) -> (i32, i32) {
    %c0_i32 = arith.constant 0 : i32
    %c0_i32_0 = arith.constant 0 : i32
    return %c0_i32, %arg1 : i32, i32
  }
  func.func @transform_1(%arg0: i32, %arg1: i32) -> (i32, i32) {
    %c0_i32 = arith.constant 0 : i32
    return %arg1, %arg0 : i32, i32
  }
  func.func @transform_2(%arg0: i32, %arg1: i32) -> (i32, i32) {
    %c0_i32 = arith.constant 0 : i32
    %c0_i32_0 = arith.constant 0 : i32
    return %c0_i32, %arg0 : i32, i32
  }
  func.func @transform_3(%arg0: i32, %arg1: i32) -> (i32, i32) {
    %c0_i32 = arith.constant 0 : i32
    %c0_i32_0 = arith.constant 0 : i32
    %c0_i32_1 = arith.constant 0 : i32
    return %c0_i32, %c0_i32_0 : i32, i32
  }
}

</mosaic_0001>

<bundles_post_ra>
// kernel: tpu_custom_call.1
= control target key start
LH: loop header
LB: loop body
LE: loop exit
PB: predicated region body
PF: predicated region fallthrough
CT: control target
= control target key end

     0   :  { %9 = vsyncpa [#allocation4], 0  ;;  %s1013_s0 = inlined_call_operand.hbm [shape: bf16[8,128], index: 0, kind: input, shape index: {}]   ;;  %s1014_s1 = inlined_call_operand.hbm [shape: bf16[128,1024], index: 1, kind: input, shape index: {}]   ;;  %s1015_s2 = inlined_call_operand.hbm [shape: bf16[8,1024], index: 2, kind: output, shape index: {0}]   ;;  %s1016_s3 = inlined_call_operand.hbm [shape: f32[8,128], index: 3, kind: output, shape index: {1}]  }
   0x1   :  { %10 = vsyncpa [#allocation7], 0 }
   0x2   :  { %11 = vsyncpa [#allocation5], 0 }
   0x3   :  { %12 = vsyncpa [#allocation10], 0  ;;  %s920_s12 = smov [#allocation3]   ;;  %s921_s14 = smov [#allocation6]  }
   0x4   :  { %s19_s13 = sshll.u32 %s920_s12, 4  ;;  %s28_s15 = sshll.u32 %s921_s14, 4  ;;  %s20_s13 = int_to_ptr.vmem [resolvable:$true] %s19_s13  ;;  %s948_s15 = int_to_ptr.vmem [resolvable:$true] %s28_s15 }
   0x5   :  { %s824_s18 = scalar_lea.hbm %s1013_s0, 64 }
   0x6   :  { %p825_p0 = scmp.ne.s32.totalorder %s1013_s0, %s824_s18  ;;  %p828_p1 = scmp.lt.u32.totalorder %s824_s18, %s1013_s0 }
   0x8   :  { %p830_p2 = pnand %p828_p1, %p825_p0 }
   0xa   :  { %833 = shalt.err (!%p830_p2)
}
   0xb   :  { %s834_s23 = scalar_lea.vmem %s20_s13, 64  ;;  %p839_p4 = scmp.lt.s32.totalorder %s20_s13, %s20_s13 }
   0xc   :  { %p835_p3 = scmp.ne.s32.totalorder %s20_s13, %s834_s23  ;;  %p840_p5 = scmp.lt.s32.totalorder %s834_s23, %s834_s23 }
   0xe   :  { %p841_p6 = por %p840_p5, %p839_p4 }
  0x10   :  { %p842_p7 = pnand %p841_p6, %p835_p3 }
  0x12   :  { %845 = shalt.err (!%p842_p7)
}
  0x13   :  { %22 = dma.hbm_to_vmem [thread:$0]  %s1013_s0, 64, %s20_s13, [#allocation4]  }
  0x14   :  { %s846_s28 = scalar_lea.hbm %s1014_s1, 8192 }
  0x15   :  { %p847_p8 = scmp.ne.s32.totalorder %s1014_s1, %s846_s28  ;;  %p850_p9 = scmp.lt.u32.totalorder %s846_s28, %s1014_s1 }
  0x17   :  { %p852_p10 = pnand %p850_p9, %p847_p8 }
  0x19   :  { %855 = shalt.err (!%p852_p10)
}
  0x1a   :  { %s856_s6 = scalar_lea.vmem %s948_s15, 8192  ;;  %p861_p12 = scmp.lt.s32.totalorder %s948_s15, %s948_s15 }
  0x1b   :  { %p857_p11 = scmp.ne.s32.totalorder %s948_s15, %s856_s6  ;;  %p862_p13 = scmp.lt.s32.totalorder %s856_s6, %s856_s6 }
  0x1d   :  { %p863_p0 = por %p862_p13, %p861_p12 }
  0x1f   :  { %p864_p1 = pnand %p863_p0, %p857_p11 }
  0x21   :  { %867 = shalt.err (!%p864_p1)
}
  0x22   :  { %s922_s0 = smov 512   ;;  %s923_s7 = smov 32  }
  0x23   :  { %34 = dma.hbm_to_vmem [thread:$0]  %s1014_s1, 8192, %s948_s15, [#allocation7], %s922_s0, %s922_s0, %s923_s7  }
  0x24   :  { %912 = dma.done.wait [#allocation4], 64  }
  0x25   :  { %913 = vsyncadd [#allocation4], 4294967232 }
  0x26   :  { %914 = dma.done.wait [#allocation7], 8192  }
  0x27   :  { %915 = vsyncadd [#allocation7], 4294959104  ;;  %v924_v0 = vmov 0   ;;  %v69_v1 = vld [vmem:[#allocation6] sm:$0xff]  ;;  %v70_v3 = vld [vmem:[#allocation6 + $0x8] sm:$0xff]  ;;  %s926_s1 = smov [#allocation8]  }
  0x28   :  { %485 = vmatprep.mubr.bf16.mxu0 %v924_v0  ;;  %526 = vmatprep.mubr.bf16.mxu1 %v924_v0  ;;  %v73_v2 = vld [vmem:[#allocation6 + $0x20] sm:$0xff]  ;;  %v74_v6 = vld [vmem:[#allocation6 + $0x28] sm:$0xff]  ;;  %v71_v63 = vld [vmem:[#allocation6 + $0x10] sm:$0xff]  ;;  %s720_s10 = sshll.u32 %s926_s1, 4  ;;  %s721_s10 = int_to_ptr.vmem [resolvable:$true] %s720_s10 }
  0x29   :  { %v745_v4 = vcombine.high %v69_v1, %v73_v2  ;;  %v744_v5 = vcombine.low %v69_v1, %v73_v2  ;;  %v77_v7 = vld [vmem:[#allocation6 + $0x40] sm:$0xff]  ;;  %v747_v9 = vcombine.high %v70_v3, %v74_v6  ;;  %v746_v10 = vcombine.low %v70_v3, %v74_v6  ;;  %v78_v12 = vld [vmem:[#allocation6 + $0x48] sm:$0xff]  ;;  %v75_v1 = vld [vmem:[#allocation6 + $0x30] sm:$0xff]  ;;  %s868_s11 = scalar_lea.vmem %s721_s10, 512  ;;  %p873_p3 = scmp.lt.s32.totalorder %s721_s10, %s721_s10 }
  0x2a   :  { %v81_v8 = vld [vmem:[#allocation6 + $0x60] sm:$0xff]  ;;  %v82_v13 = vld [vmem:[#allocation6 + $0x68] sm:$0xff]  ;;  %v72_v2 = vld [vmem:[#allocation6 + $0x18] sm:$0xff]  ;;  %v749_v6 = vcombine.high %v71_v63, %v75_v1  ;;  %p869_p2 = scmp.ne.s32.totalorder %s721_s10, %s868_s11  ;;  %p874_p4 = scmp.lt.s32.totalorder %s868_s11, %s868_s11 }
  0x2b   :  { %v753_v11 = vcombine.high %v77_v7, %v81_v8  ;;  %v85_v14 = vld [vmem:[#allocation6 + $0x80] sm:$0xff]  ;;  %453 = vmatprep.subr.bf16.mxu0 %v745_v4  ;;  %v755_v15 = vcombine.high %v78_v12, %v82_v13  ;;  %v86_v17 = vld [vmem:[#allocation6 + $0x88] sm:$0xff]  ;;  %494 = vmatprep.subr.bf16.mxu1 %v747_v9  ;;  %v752_v19 = vcombine.low %v77_v7, %v81_v8  ;;  %v76_v3 = vld [vmem:[#allocation6 + $0x38] sm:$0xff] }
  0x2c   :  { %v89_v16 = vld [vmem:[#allocation6 + $0xa0] sm:$0xff]  ;;  %v90_v18 = vld [vmem:[#allocation6 + $0xa8] sm:$0xff]  ;;  %454 = vmatpush1.bf16.msra.mxu0 %v744_v5  ;;  %495 = vmatpush1.bf16.msra.mxu1 %v746_v10  ;;  %v754_v20 = vcombine.low %v78_v12, %v82_v13  ;;  %v751_v7 = vcombine.high %v72_v2, %v76_v3  ;;  %v79_v8 = vld [vmem:[#allocation6 + $0x50] sm:$0xff]  ;;  %v748_v13 = vcombine.low %v71_v63, %v75_v1  ;;  %p875_p5 = por %p874_p4, %p873_p3 }
  0x2d   :  { %455 = vmatprep.subr.bf16.mxu0 %v753_v11  ;;  %v761_v21 = vcombine.high %v85_v14, %v89_v16  ;;  %496 = vmatprep.subr.bf16.mxu1 %v755_v15  ;;  %v763_v22 = vcombine.high %v86_v17, %v90_v18  ;;  %v93_v23 = vld [vmem:[#allocation6 + $0xc0] sm:$0xff]  ;;  %v94_v25 = vld [vmem:[#allocation6 + $0xc8] sm:$0xff]  ;;  %v760_v27 = vcombine.low %v85_v14, %v89_v16  ;;  %v83_v9 = vld [vmem:[#allocation6 + $0x70] sm:$0xff] }
  0x2e   :  { %v97_v24 = vld [vmem:[#allocation6 + $0xe0] sm:$0xff]  ;;  %v98_v26 = vld [vmem:[#allocation6 + $0xe8] sm:$0xff]  ;;  %v762_v28 = vcombine.low %v86_v17, %v90_v18  ;;  %v80_v10 = vld [vmem:[#allocation6 + $0x58] sm:$0xff]  ;;  %v750_v14 = vcombine.low %v72_v2, %v76_v3  ;;  %v757_v15 = vcombine.high %v79_v8, %v83_v9  ;;  %v925_v3 = vmov 0.0   ;;  %p876_p6 = pnand %p875_p5, %p869_p2 }
  0x2f   :  { %v769_v29 = vcombine.high %v93_v23, %v97_v24  ;;  %v771_v30 = vcombine.high %v94_v25, %v98_v26  ;;  %v101_v31 = vld [vmem:[#allocation6 + $0x100] sm:$0xff]  ;;  %v102_v33 = vld [vmem:[#allocation6 + $0x108] sm:$0xff]  ;;  %v768_v35 = vcombine.low %v93_v23, %v97_v24  ;;  %v770_v36 = vcombine.low %v94_v25, %v98_v26  ;;  %v84_v11 = vld [vmem:[#allocation6 + $0x78] sm:$0xff]  ;;  %48 = vst [vmem:[#allocation9] sm:$0xff] %v925_v3 }
  0x30   :  { %456 = vmatpush1.bf16.msra.mxu0 %v752_v19  ;;  %497 = vmatpush1.bf16.msra.mxu1 %v754_v20  ;;  %v105_v32 = vld [vmem:[#allocation6 + $0x120] sm:$0xff]  ;;  %v106_v34 = vld [vmem:[#allocation6 + $0x128] sm:$0xff]  ;;  %v981_v12 = vld [vmem:[#allocation3] sm:$0xf]  ;;  %v759_v16 = vcombine.high %v80_v10, %v84_v11 }
  0x31   :  { %457 = vmatprep.subr.bf16.mxu0 %v761_v21  ;;  %498 = vmatprep.subr.bf16.mxu1 %v763_v22  ;;  %v777_v37 = vcombine.high %v101_v31, %v105_v32  ;;  %v779_v38 = vcombine.high %v102_v33, %v106_v34  ;;  %v109_v39 = vld [vmem:[#allocation6 + $0x140] sm:$0xff]  ;;  %v110_v41 = vld [vmem:[#allocation6 + $0x148] sm:$0xff]  ;;  %v776_v43 = vcombine.low %v101_v31, %v105_v32  ;;  %v87_v17 = vld [vmem:[#allocation6 + $0x90] sm:$0xff] }
  0x32   :  { %v113_v40 = vld [vmem:[#allocation6 + $0x160] sm:$0xff]  ;;  %v114_v42 = vld [vmem:[#allocation6 + $0x168] sm:$0xff]  ;;  %v778_v44 = vcombine.low %v102_v33, %v106_v34  ;;  %v91_v18 = vld [vmem:[#allocation6 + $0xb0] sm:$0xff]  ;;  %v756_v21 = vcombine.low %v79_v8, %v83_v9  ;;  %v758_v22 = vcombine.low %v80_v10, %v84_v11 }
  0x33   :  { %v785_v45 = vcombine.high %v109_v39, %v113_v40  ;;  %v787_v46 = vcombine.high %v110_v41, %v114_v42  ;;  %v117_v47 = vld [vmem:[#allocation6 + $0x180] sm:$0xff]  ;;  %v118_v49 = vld [vmem:[#allocation6 + $0x188] sm:$0xff]  ;;  %v784_v51 = vcombine.low %v109_v39, %v113_v40  ;;  %v786_v52 = vcombine.low %v110_v41, %v114_v42  ;;  %v88_v19 = vld [vmem:[#allocation6 + $0x98] sm:$0xff] }
  0x34   :  { %458 = vmatpush1.bf16.msra.mxu0 %v760_v27  ;;  %499 = vmatpush1.bf16.msra.mxu1 %v762_v28  ;;  %v121_v48 = vld [vmem:[#allocation6 + $0x1a0] sm:$0xff]  ;;  %v122_v50 = vld [vmem:[#allocation6 + $0x1a8] sm:$0xff]  ;;  %v92_v20 = vld [vmem:[#allocation6 + $0xb8] sm:$0xff]  ;;  %v765_v23 = vcombine.high %v87_v17, %v91_v18 }
  0x35   :  { %459 = vmatprep.subr.bf16.mxu0 %v769_v29  ;;  %500 = vmatprep.subr.bf16.mxu1 %v771_v30  ;;  %v793_v53 = vcombine.high %v117_v47, %v121_v48  ;;  %v795_v54 = vcombine.high %v118_v49, %v122_v50  ;;  %v125_v55 = vld [vmem:[#allocation6 + $0x1c0] sm:$0xff]  ;;  %v126_v57 = vld [vmem:[#allocation6 + $0x1c8] sm:$0xff]  ;;  %v792_v59 = vcombine.low %v117_v47, %v121_v48  ;;  %v95_v25 = vld [vmem:[#allocation6 + $0xd0] sm:$0xff] }
  0x36   :  { %v129_v56 = vld [vmem:[#allocation6 + $0x1e0] sm:$0xff]  ;;  %v130_v58 = vld [vmem:[#allocation6 + $0x1e8] sm:$0xff]  ;;  %v794_v60 = vcombine.low %v118_v49, %v122_v50  ;;  %v767_v24 = vcombine.high %v88_v19, %v92_v20  ;;  %v99_v26 = vld [vmem:[#allocation6 + $0xf0] sm:$0xff]  ;;  %v764_v29 = vcombine.low %v87_v17, %v91_v18  ;;  %v766_v30 = vcombine.low %v88_v19, %v92_v20 }
  0x37   :  { %v801_v61 = vcombine.high %v125_v55, %v129_v56  ;;  %v803_v62 = vcombine.high %v126_v57, %v130_v58  ;;  %v800_v4 = vcombine.low %v125_v55, %v129_v56  ;;  %v802_v5 = vcombine.low %v126_v57, %v130_v58  ;;  %v96_v27 = vld [vmem:[#allocation6 + $0xd8] sm:$0xff]  ;;  %v103_v33 = vld [vmem:[#allocation6 + $0x110] sm:$0xff] }
  0x38   :  { %460 = vmatpush1.bf16.msra.mxu0 %v768_v35  ;;  %501 = vmatpush1.bf16.msra.mxu1 %v770_v36  ;;  %v100_v28 = vld [vmem:[#allocation6 + $0xf8] sm:$0xff]  ;;  %v773_v31 = vcombine.high %v95_v25, %v99_v26  ;;  %v107_v34 = vld [vmem:[#allocation6 + $0x130] sm:$0xff] }
  0x39   :  { %461 = vmatprep.subr.bf16.mxu0 %v777_v37  ;;  %502 = vmatprep.subr.bf16.mxu1 %v779_v38  ;;  %v775_v32 = vcombine.high %v96_v27, %v100_v28  ;;  %v104_v35 = vld [vmem:[#allocation6 + $0x118] sm:$0xff]  ;;  %v772_v37 = vcombine.low %v95_v25, %v99_v26  ;;  %v774_v38 = vcombine.low %v96_v27, %v100_v28  ;;  %v111_v40 = vld [vmem:[#allocation6 + $0x150] sm:$0xff] }
  0x3a   :  { %v108_v36 = vld [vmem:[#allocation6 + $0x138] sm:$0xff]  ;;  %v781_v39 = vcombine.high %v103_v33, %v107_v34  ;;  %v115_v41 = vld [vmem:[#allocation6 + $0x170] sm:$0xff] }
  0x3b   :  { %v112_v42 = vld [vmem:[#allocation6 + $0x158] sm:$0xff]  ;;  %v119_v48 = vld [vmem:[#allocation6 + $0x190] sm:$0xff] }
  0x3c   :  { %462 = vmatpush1.bf16.msra.mxu0 %v776_v43  ;;  %503 = vmatpush1.bf16.msra.mxu1 %v778_v44  ;;  %v116_v43 = vld [vmem:[#allocation6 + $0x178] sm:$0xff]  ;;  %v780_v44 = vcombine.low %v103_v33, %v107_v34  ;;  %v123_v49 = vld [vmem:[#allocation6 + $0x1b0] sm:$0xff] }
  0x3d   :  { %463 = vmatprep.subr.bf16.mxu0 %v785_v45  ;;  %504 = vmatprep.subr.bf16.mxu1 %v787_v46  ;;  %v782_v45 = vcombine.low %v104_v35, %v108_v36  ;;  %v789_v46 = vcombine.high %v111_v40, %v115_v41  ;;  %v791_v47 = vcombine.high %v112_v42, %v116_v43  ;;  %v120_v50 = vld [vmem:[#allocation6 + $0x198] sm:$0xff]  ;;  %v127_v56 = vld [vmem:[#allocation6 + $0x1d0] sm:$0xff] }
  0x3e   :  { %v131_v57 = vld [vmem:[#allocation6 + $0x1f0] sm:$0xff]  ;;  %v128_v58 = vld [vmem:[#allocation6 + $0x1d8] sm:$0xff] }
  0x3f   :  { %v804_v1 = vcombine.low %v127_v56, %v131_v57 }
  0x40   :  { %464 = vmatpush1.bf16.msra.mxu0 %v784_v51  ;;  %505 = vmatpush1.bf16.msra.mxu1 %v786_v52  ;;  %v124_v51 = vld [vmem:[#allocation6 + $0x1b8] sm:$0xff]  ;;  %v788_v52 = vcombine.low %v111_v40, %v115_v41 }
  0x41   :  { %465 = vmatprep.subr.bf16.mxu0 %v793_v53  ;;  %506 = vmatprep.subr.bf16.mxu1 %v795_v54  ;;  %v790_v53 = vcombine.low %v112_v42, %v116_v43  ;;  %v797_v54 = vcombine.high %v119_v48, %v123_v49  ;;  %v799_v55 = vcombine.high %v120_v50, %v124_v51 }
  0x44   :  { %466 = vmatpush1.bf16.msra.mxu0 %v792_v59  ;;  %507 = vmatpush1.bf16.msra.mxu1 %v794_v60  ;;  %v132_v59 = vld [vmem:[#allocation6 + $0x1f8] sm:$0xff]  ;;  %v796_v60 = vcombine.low %v119_v48, %v123_v49 }
  0x45   :  { %467 = vmatprep.subr.bf16.mxu0 %v801_v61  ;;  %508 = vmatprep.subr.bf16.mxu1 %v803_v62  ;;  %v798_v61 = vcombine.low %v120_v50, %v124_v51  ;;  %v805_v62 = vcombine.high %v127_v56, %v131_v57  ;;  %v807_v63 = vcombine.high %v128_v58, %v132_v59 }
  0x46   :  { %v806_v2 = vcombine.low %v128_v58, %v132_v59 }
  0x48   :  { %468 = vmatpush1.bf16.msra.mxu0 %v800_v4  ;;  %509 = vmatpush1.bf16.msra.mxu1 %v802_v5 }
  0x49   :  { %535 = vmatprep.subr.bf16.mxu0 %v749_v6  ;;  %576 = vmatprep.subr.bf16.mxu1 %v751_v7 }
  0x4b   :  { %486 = vmatmul.mubr.bf16.vlgmr.msra.gmra.mrb[0].mxu0 %v981_v12  ;;  %527 = vmatmul.mubr.bf16.vlgmr.msra.gmra.mrb[0].mxu1 %v981_v12 }
  0x4c   :  { %536 = vmatpush1.bf16.msra.mxu0 %v748_v13  ;;  %577 = vmatpush1.bf16.msra.mxu1 %v750_v14 }
  0x4d   :  { %537 = vmatprep.subr.bf16.mxu0 %v757_v15  ;;  %578 = vmatprep.subr.bf16.mxu1 %v759_v16 }
  0x4e   :  { %567 = vmatprep.mubr.bf16.mxu0 %v924_v0  ;;  %608 = vmatprep.mubr.bf16.mxu1 %v924_v0  ;;  %v783_v0 = vcombine.high %v104_v35, %v108_v36 }
  0x50   :  { %538 = vmatpush1.bf16.msra.mxu0 %v756_v21  ;;  %579 = vmatpush1.bf16.msra.mxu1 %v758_v22 }
  0x51   :  { %539 = vmatprep.subr.bf16.mxu0 %v765_v23  ;;  %580 = vmatprep.subr.bf16.mxu1 %v767_v24 }
  0x54   :  { %540 = vmatpush1.bf16.msra.mxu0 %v764_v29  ;;  %581 = vmatpush1.bf16.msra.mxu1 %v766_v30 }
  0x55   :  { %541 = vmatprep.subr.bf16.mxu0 %v773_v31  ;;  %582 = vmatprep.subr.bf16.mxu1 %v775_v32 }
  0x58   :  { %542 = vmatpush1.bf16.msra.mxu0 %v772_v37  ;;  %583 = vmatpush1.bf16.msra.mxu1 %v774_v38 }
  0x59   :  { %543 = vmatprep.subr.bf16.mxu0 %v781_v39  ;;  %584 = vmatprep.subr.bf16.mxu1 %v783_v0 }
  0x5c   :  { %544 = vmatpush1.bf16.msra.mxu0 %v780_v44  ;;  %585 = vmatpush1.bf16.msra.mxu1 %v782_v45 }
  0x5d   :  { %545 = vmatprep.subr.bf16.mxu0 %v789_v46  ;;  %586 = vmatprep.subr.bf16.mxu1 %v791_v47 }
  0x60   :  { %546 = vmatpush1.bf16.msra.mxu0 %v788_v52  ;;  %587 = vmatpush1.bf16.msra.mxu1 %v790_v53 }
  0x61   :  { %547 = vmatprep.subr.bf16.mxu0 %v797_v54  ;;  %588 = vmatprep.subr.bf16.mxu1 %v799_v55 }
  0x64   :  { %548 = vmatpush1.bf16.msra.mxu0 %v796_v60  ;;  %589 = vmatpush1.bf16.msra.mxu1 %v798_v61 }
  0x65   :  { %549 = vmatprep.subr.bf16.mxu0 %v805_v62  ;;  %590 = vmatprep.subr.bf16.mxu1 %v807_v63 }
  0x68   :  { %550 = vmatpush1.bf16.msra.mxu0 %v804_v1  ;;  %591 = vmatpush1.bf16.msra.mxu1 %v806_v2 }
  0x6b   :  { %568 = vmatmul.mubr.bf16.vlgmr.msra.gmra.mrb[4].mxu0 %v981_v12  ;;  %609 = vmatmul.mubr.bf16.vlgmr.msra.gmra.mrb[4].mxu1 %v981_v12 }
 0x11e   :  { %v487_v4 = vpop.f32.mrb[0].mxu0  ;;  %v528_v7 = vpop.f32.mrb[0].mxu1 }
 0x11f   :  { %v694_v5 = vmul.f32 %v487_v4, %v487_v4  ;;  %v489_v6 = vpop.f32.mrb[1].mxu0  ;;  %v696_v13 = vmul.f32 %v528_v7, %v528_v7  ;;  %v530_v14 = vpop.f32.mrb[1].mxu1 }
 0x120   :  { %v812_v8 = vpack.c.bf16 %v489_v6, %v487_v4  ;;  %v681_v9 = vadd.f32 %v489_v6, %v487_v4  ;;  %v695_v10 = vmul.f32 %v489_v6, %v489_v6  ;;  %v491_v11 = vpop.f32.mrb[2].mxu0  ;;  %v813_v16 = vpack.c.bf16 %v530_v14, %v528_v7  ;;  %v532_v17 = vpop.f32.mrb[2].mxu1 }
 0x121   :  { %v492_v15 = vpop.f32.mrb[3].mxu0  ;;  %v697_v20 = vmul.f32 %v530_v14, %v530_v14  ;;  %v533_v12 = vpop.f32.mrb[3].mxu1 }
 0x122   :  { %676 = vst [vmem:[#allocation8] sm:$0xff] %v812_v8  ;;  %v702_v18 = vadd.f32 %v695_v10, %v694_v5  ;;  %v682_v19 = vadd.f32 %v681_v9, %v528_v7  ;;  %677 = vst [vmem:[#allocation8 + $0x8] sm:$0xff] %v813_v16 }
 0x124   :  { %v703_v21 = vadd.f32 %v702_v18, %v696_v13  ;;  %v683_v22 = vadd.f32 %v682_v19, %v530_v14 }
 0x126   :  { %v704_v23 = vadd.f32 %v703_v21, %v697_v20 }
 0x13e   :  { %v569_v24 = vpop.f32.mrb[4].mxu0  ;;  %v610_v28 = vpop.f32.mrb[4].mxu1 }
 0x13f   :  { %v684_v25 = vadd.f32 %v683_v22, %v569_v24  ;;  %v698_v26 = vmul.f32 %v569_v24, %v569_v24  ;;  %v571_v27 = vpop.f32.mrb[5].mxu0  ;;  %v612_v32 = vpop.f32.mrb[5].mxu1  ;;  %v700_v35 = vmul.f32 %v610_v28, %v610_v28 }
 0x140   :  { %v814_v29 = vpack.c.bf16 %v571_v27, %v569_v24  ;;  %v699_v30 = vmul.f32 %v571_v27, %v571_v27  ;;  %v573_v31 = vpop.f32.mrb[6].mxu0  ;;  %v815_v36 = vpack.c.bf16 %v612_v32, %v610_v28  ;;  %v614_v38 = vpop.f32.mrb[6].mxu1  ;;  %v701_v42 = vmul.f32 %v612_v32, %v612_v32 }
 0x141   :  { %v705_v33 = vadd.f32 %v704_v23, %v698_v26  ;;  %v685_v34 = vadd.f32 %v684_v25, %v571_v27  ;;  %v574_v37 = vpop.f32.mrb[7].mxu0  ;;  %v615_v39 = vpop.f32.mrb[7].mxu1 }
 0x142   :  { %678 = vst [vmem:[#allocation8 + $0x10] sm:$0xff] %v814_v29  ;;  %679 = vst [vmem:[#allocation8 + $0x18] sm:$0xff] %v815_v36 }
 0x143   :  { %v686_v0 = vadd.f32 %v685_v34, %v610_v28  ;;  %v706_v40 = vadd.f32 %v705_v33, %v699_v30 }
 0x145   :  { %v687_v41 = vadd.f32 %v686_v0, %v612_v32  ;;  %v707_v43 = vadd.f32 %v706_v40, %v700_v35 }
 0x147   :  { %688 = vadd.xlane.f32.xlu0 %v687_v41  ;;  %v708_v44 = vadd.f32 %v707_v43, %v701_v42 }
 0x14b   :  { %709 = vadd.xlane.f32.xlu0 %v708_v44 }
 0x14c   :  { %879 = shalt.err (!%p876_p6)
}
 0x14d   :  { %s880_s14 = scalar_lea.hbm %s1015_s2, 512 }
 0x14e   :  { %p881_p7 = scmp.ne.s32.totalorder %s1015_s2, %s880_s14  ;;  %p884_p8 = scmp.lt.u32.totalorder %s880_s14, %s1015_s2 }
 0x150   :  { %p886_p9 = pnand %p884_p8, %p881_p7 }
 0x152   :  { %889 = shalt.err (!%p886_p9)
}
 0x153   :  { %723 = dma.vmem_to_hbm [thread:$0]  %s721_s10, 512, %s1015_s2, [#allocation5]   ;;  %vm691_vm0 = vcmask 7168   ;;  %vm712_vm1 = vcmask 15368  }
 0x154   :  { %s927_s21 = smov [#allocation9]  }
 0x155   :  { %s730_s22 = sshll.u32 %s927_s21, 4  ;;  %s731_s22 = int_to_ptr.vmem [resolvable:$true] %s730_s22 }
 0x156   :  { %s890_s23 = scalar_lea.vmem %s731_s22, 128  ;;  %p895_p11 = scmp.lt.s32.totalorder %s731_s22, %s731_s22 }
 0x157   :  { %p891_p10 = scmp.ne.s32.totalorder %s731_s22, %s890_s23  ;;  %p896_p12 = scmp.lt.s32.totalorder %s890_s23, %s890_s23 }
 0x159   :  { %p897_p13 = por %p896_p12, %p895_p11 }
 0x15b   :  { %p898_p0 = pnand %p897_p13, %p891_p10 }
 0x1d4   :  { %v689_v45 = vpop.xlane.xlu0 %688 }
 0x1d5   :  { %692 = vst.msk [vmem:[#allocation9] sm:$0xff] %vm691_vm0, %v689_v45 }
 0x1d8   :  { %v710_v46 = vpop.xlane.xlu0 %709 }
 0x1dc   :  { %v693_v47 = vld [vmem:[#allocation9] sm:$0xff] }
 0x1dd   :  { %v711_v48 = vadd.f32 %v710_v46, %v693_v47 }
 0x1df   :  { %713 = vst.msk [vmem:[#allocation9] sm:$0xff] %vm712_vm1, %v711_v48 }
 0x1e0   :  { %901 = shalt.err (!%p898_p0)
}
 0x1e1   :  { %s902_s25 = scalar_lea.hbm %s1016_s3, 128 }
 0x1e2   :  { %p903_p1 = scmp.ne.s32.totalorder %s1016_s3, %s902_s25  ;;  %p906_p2 = scmp.lt.u32.totalorder %s902_s25, %s1016_s3 }
 0x1e4   :  { %p908_p3 = pnand %p906_p2, %p903_p1 }
 0x1e6   :  { %911 = shalt.err (!%p908_p3)
}
 0x1e7   :  { %733 = dma.vmem_to_hbm [thread:$0]  %s731_s22, 128, %s1016_s3, [#allocation10]  }
 0x1e8   :  { %916 = dma.done.wait [#allocation5], 512  }
 0x1e9   :  { %917 = vsyncadd [#allocation5], 4294966784 }
 0x1ea   :  { %918 = dma.done.wait [#allocation10], 128  }
 0x1eb   :  { %919 = vsyncadd [#allocation10], 4294967168 }
 0x1ec   :  { %740 = vsyncpa [#allocation4], 1 }
 0x1ed   :  { %741 = vsyncpa [#allocation7], 1 }
 0x1ee   :  { %742 = vsyncpa [#allocation5], 1 }
 0x1ef   :  { %743 = vsyncpa [#allocation10], 1 }

</bundles_post_ra>
